<compile_context>
chip_gen: v7x
topology: tpu7x:2x2x1
jax: 0.10.0
libtpu: 0.0.40
codegen_flags: <defaults>
</compile_context>

<pallas_src>
import functools

import jax
import jax.numpy as jnp
from jax import lax
from jax.experimental import pallas as pl
from jax.experimental.pallas import tpu as pltpu


# ---------------------------------------------------------------------------
# Tiling / compiler-parameter helpers
# ---------------------------------------------------------------------------
_LANE = 128
_SUBLANE = 8
_MAX_LANE_TILE = 32768                    # lanes per batch tile (1 MiB f32 @ C<=8)
_TILE_BUDGET_BYTES = 2 * 1024 * 1024      # per logits buffer (x2 double-buffering)


def _round_up(x, m):
    return ((x + m - 1) // m) * m


@functools.lru_cache(maxsize=None)
def _vmem_limit_bytes():
    """Generation-aware scoped-VMEM limit: half of physical, capped at 64 MiB.

    => 64 MiB on v5e/v6e (128 MiB physical), 32 MiB on v7x (64 MiB physical).
    """
    cap = None
    try:
        cap = getattr(pltpu.get_tpu_info(), "vmem_capacity_bytes", None)
    except Exception:
        cap = None
    if not cap:
        cap = 64 * 1024 * 1024
    return int(min(cap // 2, 64 * 1024 * 1024))


def _compiler_params(semantics):
    return pltpu.CompilerParams(
        dimension_semantics=semantics,
        vmem_limit_bytes=_vmem_limit_bytes(),
    )


def _pick_lane_tile(batch, num_classes, itemsize=4, tile_lanes=None):
    """Batch elements (lanes) per tile for the lane-dense (C, B) layout."""
    if tile_lanes is None:
        # bytes per lane-column of the logits tile, sublane-padded to 8
        sub_rows = _round_up(max(num_classes, 1), _SUBLANE)
        tile_lanes = _TILE_BUDGET_BYTES // (sub_rows * itemsize)
    tile_lanes = max(_LANE, min(_MAX_LANE_TILE, tile_lanes))
    tile_lanes = (tile_lanes // _LANE) * _LANE
    if batch <= tile_lanes:
        return batch                       # single full-dim tile (always legal)
    return tile_lanes


# ---------------------------------------------------------------------------
# Kernels (all operate on the lane-dense transposed layout: logits (C, TBL))
# ---------------------------------------------------------------------------
def _tile_stats_t(logits_ref, labels_ref, total_b):
    """Per-tile softmax pieces + masked NLL / correct-count sums."""
    x = logits_ref[...].astype(jnp.float32)             # (C, TBL)
    labels = labels_ref[...]                             # (1, TBL) int32
    c, tbl = x.shape

    # validity mask for a ragged last tile (mean divisor is always the full B)
    lane = lax.broadcasted_iota(jnp.int32, (1, tbl), 1)
    valid = (pl.program_id(0) * tbl + lane) < total_b    # (1, TBL) bool

    m = jnp.max(x, axis=0, keepdims=True)                # (1, TBL) per-sample max
    z = x - m
    e = jnp.exp(z)
    s = jnp.sum(e, axis=0, keepdims=True)                # softmax denominator
    lse = jnp.log(s)                                     # shifted log-sum-exp

    cls = lax.broadcasted_iota(jnp.int32, (c, tbl), 0)
    onehot = cls == labels                               # (C, TBL)
    # nll = lse - z[label]  (no full log-softmax tensor materialized)
    picked = jnp.sum(jnp.where(onehot, z, 0.0), axis=0, keepdims=True)
    nll = lse - picked                                   # (1, TBL)

    # torch.argmax tie-break == first index attaining the per-sample max
    labels_hat = jnp.min(jnp.where(x == m, cls, c), axis=0, keepdims=True)
    correct = (labels_hat == labels).astype(jnp.float32)

    # where-SELECTs keep pad-lane garbage (inf/NaN) out of the sums
    loss_sum = jnp.sum(jnp.where(valid, nll, 0.0))
    correct_sum = jnp.sum(jnp.where(valid, correct, 0.0))
    return e, s, loss_sum, correct_sum


def _write_partials(partial_ref, loss_sum, correct_sum):
    """Each grid step owns one (8,128) block: loss at col 0, correct at col 1."""
    col = lax.broadcasted_iota(jnp.int32, partial_ref.shape, 1)
    partial_ref[...] = jnp.where(
        col == 0, loss_sum, jnp.where(col == 1, correct_sum, 0.0)
    )


def _metrics_kernel(logits_ref, labels_ref, partial_ref, *, total_b):
    # fused cross-entropy + accuracy partial sums: single read of the tile
    _, _, loss_sum, correct_sum = _tile_stats_t(logits_ref, labels_ref, total_b)
    _write_partials(partial_ref, loss_sum, correct_sum)


def _fused_eval_kernel(logits_ref, labels_ref, probs_ref, partial_ref, *, total_b):
    # aggregate_outputs path: loss + softmax probs + accuracy in one pass
    e, s, loss_sum, correct_sum = _tile_stats_t(logits_ref, labels_ref, total_b)
    # lane-dense, unmasked store (TBL is a multiple of 128 or the full batch)
    probs_ref[...] = (e * pl.reciprocal(s, approx=False)).astype(probs_ref.dtype)
    _write_partials(partial_ref, loss_sum, correct_sum)


def _softmax_kernel(x_ref, o_ref):
    x = x_ref[...].astype(jnp.float32)                   # (C, TBL)
    m = jnp.max(x, axis=0, keepdims=True)
    e = jnp.exp(x - m)
    s = jnp.sum(e, axis=0, keepdims=True)
    o_ref[...] = (e * pl.reciprocal(s, approx=False)).astype(o_ref.dtype)


# ---------------------------------------------------------------------------
# Wrappers (grid / BlockSpec plumbing; wrapper transposes to the (C,B) layout)
# ---------------------------------------------------------------------------
def _finish_means(partials, num_tiles, batch):
    p = partials.reshape(num_tiles, _SUBLANE, _LANE)
    loss = jnp.sum(p[:, 0, 0]) / batch
    acc = jnp.sum(p[:, 0, 1]) / batch
    return loss, acc


def pallas_loss_and_accuracy(logits, labels, tile_lanes=None):
    """One pass over the logits -> (mean cross-entropy, accuracy)."""
    b, c = logits.shape
    logits_t = jnp.transpose(logits)                     # (C, B): batch on lanes
    labels_row = labels.reshape(1, b).astype(jnp.int32)  # lane-dense labels
    tbl = _pick_lane_tile(b, c, jnp.dtype(logits.dtype).itemsize, tile_lanes)
    nt = pl.cdiv(b, tbl)
    partials = pl.pallas_call(
        functools.partial(_metrics_kernel, total_b=b),
        out_shape=jax.ShapeDtypeStruct((nt * _SUBLANE, _LANE), jnp.float32),
        grid=(nt,),
        in_specs=[pl.BlockSpec((c, tbl), lambda i: (0, i)),
                  pl.BlockSpec((1, tbl), lambda i: (0, i))],
        out_specs=pl.BlockSpec((_SUBLANE, _LANE), lambda i: (i, 0)),
        compiler_params=_compiler_params(("parallel",)),
    )(logits_t, labels_row)
    return _finish_means(partials, nt, b)


def pallas_fused_evaluation(logits, labels, tile_lanes=None):
    """One pass over the logits -> (mean cross-entropy, accuracy, softmax probs)."""
    b, c = logits.shape
    logits_t = jnp.transpose(logits)
    labels_row = labels.reshape(1, b).astype(jnp.int32)
    tbl = _pick_lane_tile(b, c, jnp.dtype(logits.dtype).itemsize, tile_lanes)
    nt = pl.cdiv(b, tbl)
    probs_t, partials = pl.pallas_call(
        functools.partial(_fused_eval_kernel, total_b=b),
        out_shape=(jax.ShapeDtypeStruct((c, b), logits.dtype),
                   jax.ShapeDtypeStruct((nt * _SUBLANE, _LANE), jnp.float32)),
        grid=(nt,),
        in_specs=[pl.BlockSpec((c, tbl), lambda i: (0, i)),
                  pl.BlockSpec((1, tbl), lambda i: (0, i))],
        out_specs=(pl.BlockSpec((c, tbl), lambda i: (0, i)),
                   pl.BlockSpec((_SUBLANE, _LANE), lambda i: (i, 0))),
        compiler_params=_compiler_params(("parallel",)),
    )(logits_t, labels_row)
    loss, acc = _finish_means(partials, nt, b)
    return loss, acc, jnp.transpose(probs_t)


def pallas_softmax(x, tile_lanes=None):
    b, c = x.shape
    x_t = jnp.transpose(x)
    tbl = _pick_lane_tile(b, c, jnp.dtype(x.dtype).itemsize, tile_lanes)
    nt = pl.cdiv(b, tbl)
    probs_t = pl.pallas_call(
        _softmax_kernel,
        out_shape=jax.ShapeDtypeStruct((c, b), x.dtype),
        grid=(nt,),
        in_specs=[pl.BlockSpec((c, tbl), lambda i: (0, i))],
        out_specs=pl.BlockSpec((c, tbl), lambda i: (0, i)),
        compiler_params=_compiler_params(("parallel",)),
    )(x_t)
    return jnp.transpose(probs_t)


# ---------------------------------------------------------------------------
# Module-equivalent wrapper
# ---------------------------------------------------------------------------
class SequenceClassificationModel:
    """JAX/Pallas port of the (abstract) PyTorch SequenceClassificationModel."""

    def __init__(self, num_classes, sequence_length, contains_dropout):
        self.num_classes = num_classes
        self.sequence_length = sequence_length
        self.contains_dropout = contains_dropout

    def forward(self, x):
        # TODO(synk): forward() is abstract (raises NotImplementedError) in the
        # reference module; no forward compute to translate.
        raise NotImplementedError()

    def loss(self, logits, labels):
        # F.cross_entropy(logits, labels)
        # NOTE: callers that also need accuracy should use training_metrics()
        # (one fused kernel launch instead of two).
        loss, _ = pallas_loss_and_accuracy(logits, labels)
        return loss

    def calculate_accuracy(self, pred, target):
        # torch.argmax(pred, dim=1).eq(target).float().mean()
        _, acc = pallas_loss_and_accuracy(pred, target)
        return acc

    def training_metrics(self, pred, target):
        # numeric core of training_step: loss + train accuracy, one logits pass
        return pallas_loss_and_accuracy(pred, target)

    def aggregate_metrics(self, pred, target):
        # numeric core of aggregate_outputs: loss + softmax + accuracy, one pass
        # (argmax(softmax(x)) == argmax(x), so accuracy is computed on logits;
        #  the returned probs are reused -- no separate softmax launch needed)
        return pallas_fused_evaluation(pred, target)

    def softmax(self, pred):
        # F.softmax(pred, dim=1)
        return pallas_softmax(pred)


# ---------------------------------------------------------------------------
# Pure-JAX references (correctness check)
# ---------------------------------------------------------------------------
def _ref_cross_entropy(logits, labels):
    logp = jax.nn.log_softmax(logits.astype(jnp.float32), axis=1)
    return -jnp.mean(jnp.take_along_axis(logp, labels[:, None], axis=1))


def _ref_accuracy(pred, target):
    return jnp.mean((jnp.argmax(pred, axis=1) == target).astype(jnp.float32))


if __name__ == "__main__":
    B, C, SEQ = 8, 5, 4  # small shapes consistent with a sequence-classifier head
    key = jax.random.PRNGKey(0)
    k_logits, k_target, k_logits2, k_target2 = jax.random.split(key, 4)

    logits = jax.random.normal(k_logits, (B, C), dtype=jnp.float32)
    target = jax.random.randint(k_target, (B,), 0, C, dtype=jnp.int32)

    model = SequenceClassificationModel(
        num_classes=C, sequence_length=SEQ, contains_dropout=False
    )

    # training_step metrics path (single fused pass over the logits)
    train_loss, train_acc = model.training_metrics(logits, target)
    # standalone API methods
    loss_only = model.loss(logits, target)
    acc_only = model.calculate_accuracy(logits, target)
    # aggregate_outputs path: loss + softmax + accuracy, single logits pass
    val_loss, val_acc, probs = model.aggregate_metrics(logits, target)
    probs2 = model.softmax(logits)

    # multi-tile / ragged-last-tile / parallel-grid coverage (forced 128-lane tiles)
    B2, C2 = 300, 3
    logits2 = jax.random.normal(k_logits2, (B2, C2), dtype=jnp.float32)
    target2 = jax.random.randint(k_target2, (B2,), 0, C2, dtype=jnp.int32)
    mt_loss, mt_acc, mt_probs = pallas_fused_evaluation(logits2, target2, tile_lanes=128)
    mt_probs2 = pallas_softmax(logits2, tile_lanes=128)

    jax.block_until_ready(
        (train_loss, train_acc, loss_only, acc_only, val_loss, val_acc, probs,
         probs2, mt_loss, mt_acc, mt_probs, mt_probs2)
    )

    # verify against pure-JAX references
    loss_ref = _ref_cross_entropy(logits, target)
    acc_ref = _ref_accuracy(logits, target)                 # == acc on softmax(probs)
    probs_ref = jax.nn.softmax(logits, axis=1)

    assert jnp.allclose(train_loss, loss_ref, atol=1e-5), (train_loss, loss_ref)
    assert jnp.allclose(loss_only, loss_ref, atol=1e-5), (loss_only, loss_ref)
    assert jnp.allclose(val_loss, loss_ref, atol=1e-5), (val_loss, loss_ref)
    assert jnp.allclose(train_acc, acc_ref, atol=1e-6), (train_acc, acc_ref)
    assert jnp.allclose(acc_only, acc_ref, atol=1e-6), (acc_only, acc_ref)
    assert jnp.allclose(val_acc, acc_ref, atol=1e-6), (val_acc, acc_ref)
    assert jnp.allclose(probs, probs_ref, atol=1e-5)
    assert jnp.allclose(probs2, probs_ref, atol=1e-5)

    mt_loss_ref = _ref_cross_entropy(logits2, target2)
    mt_acc_ref = _ref_accuracy(logits2, target2)
    mt_probs_ref = jax.nn.softmax(logits2, axis=1)
    assert jnp.allclose(mt_loss, mt_loss_ref, atol=1e-5), (mt_loss, mt_loss_ref)
    assert jnp.allclose(mt_acc, mt_acc_ref, atol=1e-6), (mt_acc, mt_acc_ref)
    assert jnp.allclose(mt_probs, mt_probs_ref, atol=1e-5)
    assert jnp.allclose(mt_probs2, mt_probs_ref, atol=1e-5)

    print("KERNEL_OK")
</pallas_src>

<mosaic_0001>
module attributes {stable_mosaic.version = 11 : i64} {
  func.func @_metrics_kernel(%arg0: i32, %arg1: memref<5x8xf32, #tpu.memory_space<vmem>>, %arg2: memref<1x8xi32, #tpu.memory_space<vmem>>, %arg3: memref<8x128xf32, #tpu.memory_space<vmem>>) attributes {dimension_semantics = [#tpu.dimension_semantics<parallel>], iteration_bounds = array<i64: 1>, scalar_prefetch = 0 : i64, scratch_operands = 0 : i64, tpu.core_type = #tpu.core_type<tc>, window_params = [{transform_indices = @transform_0, window_bounds = array<i64: 5, 8>}, {transform_indices = @transform_1, window_bounds = array<i64: 1, 8>}, {transform_indices = @transform_2, window_bounds = array<i64: 8, 128>}]} {
    %c0 = arith.constant 0 : index
    %c0_0 = arith.constant 0 : index
    %0 = vector.load %arg1[%c0, %c0_0] : memref<5x8xf32, #tpu.memory_space<vmem>>, vector<5x8xf32>
    %c0_1 = arith.constant 0 : index
    %c0_2 = arith.constant 0 : index
    %1 = vector.load %arg2[%c0_1, %c0_2] : memref<1x8xi32, #tpu.memory_space<vmem>>, vector<1x8xi32>
    %2 = tpu.iota {dimensions = array<i32: 1>} : vector<1x8xi32>
    %c8_i32 = arith.constant 8 : i32
    %3 = arith.muli %arg0, %c8_i32 : i32
    %4 = vector.broadcast %3 : i32 to vector<1x8xi32>
    %5 = arith.addi %4, %2 : vector<1x8xi32>
    %c8_i32_3 = arith.constant 8 : i32
    %6 = vector.broadcast %c8_i32_3 : i32 to vector<1x8xi32>
    %7 = arith.cmpi slt, %5, %6 : vector<1x8xi32>
    %cst = arith.constant dense<0xFF800000> : vector<8xf32>
    %8 = vector.multi_reduction <maximumf>, %0, %cst [0] : vector<5x8xf32> to vector<8xf32>
    %9 = vector.shape_cast %8 : vector<8xf32> to vector<1x8xf32>
    %10 = vector.broadcast %9 : vector<1x8xf32> to vector<5x8xf32>
    %11 = arith.subf %0, %10 : vector<5x8xf32>
    %12 = math.exp %11 : vector<5x8xf32>
    %cst_4 = arith.constant dense<0.000000e+00> : vector<8xf32>
    %13 = vector.multi_reduction <add>, %12, %cst_4 [0] : vector<5x8xf32> to vector<8xf32>
    %14 = vector.shape_cast %13 : vector<8xf32> to vector<1x8xf32>
    %15 = math.log %14 : vector<1x8xf32>
    %16 = tpu.iota {dimensions = array<i32: 0>} : vector<5x8xi32>
    %17 = vector.broadcast %1 : vector<1x8xi32> to vector<5x8xi32>
    %18 = arith.cmpi eq, %16, %17 : vector<5x8xi32>
    %cst_5 = arith.constant 0.000000e+00 : f32
    %19 = vector.broadcast %cst_5 : f32 to vector<5x8xf32>
    %20 = arith.select %18, %11, %19 : vector<5x8xi1>, vector<5x8xf32>
    %cst_6 = arith.constant dense<0.000000e+00> : vector<8xf32>
    %21 = vector.multi_reduction <add>, %20, %cst_6 [0] : vector<5x8xf32> to vector<8xf32>
    %22 = vector.shape_cast %21 : vector<8xf32> to vector<1x8xf32>
    %23 = arith.subf %15, %22 : vector<1x8xf32>
    %24 = vector.broadcast %9 : vector<1x8xf32> to vector<5x8xf32>
    %25 = arith.cmpf oeq, %0, %24 : vector<5x8xf32>
    %c5_i32 = arith.constant 5 : i32
    %26 = vector.broadcast %c5_i32 : i32 to vector<5x8xi32>
    %27 = arith.select %25, %16, %26 : vector<5x8xi1>, vector<5x8xi32>
    %cst_7 = arith.constant dense<2147483647> : vector<8xi32>
    %28 = vector.multi_reduction <minsi>, %27, %cst_7 [0] : vector<5x8xi32> to vector<8xi32>
    %29 = vector.shape_cast %28 : vector<8xi32> to vector<1x8xi32>
    %30 = arith.cmpi eq, %29, %1 : vector<1x8xi32>
    %31 = arith.extui %30 : vector<1x8xi1> to vector<1x8xi32>
    %32 = arith.sitofp %31 : vector<1x8xi32> to vector<1x8xf32>
    %cst_8 = arith.constant 0.000000e+00 : f32
    %33 = vector.broadcast %cst_8 : f32 to vector<1x8xf32>
    %34 = arith.select %7, %23, %33 : vector<1x8xi1>, vector<1x8xf32>
    %35 = vector.shape_cast %34 : vector<1x8xf32> to vector<1x1x8xf32>
    %cst_9 = arith.constant dense<0.000000e+00> : vector<1xf32>
    %36 = vector.multi_reduction <add>, %35, %cst_9 [1, 2] : vector<1x1x8xf32> to vector<1xf32>
    %37 = vector.shape_cast %36 : vector<1xf32> to vector<1x1x1xf32>
    %38 = vector.extract %37[0, 0, 0] : f32 from vector<1x1x1xf32>
    %cst_10 = arith.constant 0.000000e+00 : f32
    %39 = vector.broadcast %cst_10 : f32 to vector<1x8xf32>
    %40 = arith.select %7, %32, %39 : vector<1x8xi1>, vector<1x8xf32>
    %41 = vector.shape_cast %40 : vector<1x8xf32> to vector<1x1x8xf32>
    %cst_11 = arith.constant dense<0.000000e+00> : vector<1xf32>
    %42 = vector.multi_reduction <add>, %41, %cst_11 [1, 2] : vector<1x1x8xf32> to vector<1xf32>
    %43 = vector.shape_cast %42 : vector<1xf32> to vector<1x1x1xf32>
    %44 = vector.extract %43[0, 0, 0] : f32 from vector<1x1x1xf32>
    %45 = tpu.iota {dimensions = array<i32: 1>} : vector<8x128xi32>
    %c0_i32 = arith.constant 0 : i32
    %46 = vector.broadcast %c0_i32 : i32 to vector<8x128xi32>
    %47 = arith.cmpi eq, %45, %46 : vector<8x128xi32>
    %c1_i32 = arith.constant 1 : i32
    %48 = vector.broadcast %c1_i32 : i32 to vector<8x128xi32>
    %49 = arith.cmpi eq, %45, %48 : vector<8x128xi32>
    %cst_12 = arith.constant 0.000000e+00 : f32
    %50 = vector.broadcast %44 : f32 to vector<8x128xf32>
    %51 = vector.broadcast %cst_12 : f32 to vector<8x128xf32>
    %52 = arith.select %49, %50, %51 : vector<8x128xi1>, vector<8x128xf32>
    %53 = vector.broadcast %38 : f32 to vector<8x128xf32>
    %54 = arith.select %47, %53, %52 : vector<8x128xi1>, vector<8x128xf32>
    %c0_13 = arith.constant 0 : index
    %c0_14 = arith.constant 0 : index
    %55 = vector.load %arg3[%c0_13, %c0_14] : memref<8x128xf32, #tpu.memory_space<vmem>>, vector<8x128xf32>
    tpu.vector_store %arg3[%c0_13, %c0_14], %54 {strides = array<i32>} : memref<8x128xf32, #tpu.memory_space<vmem>>, vector<8x128xf32>,
    return
  }
  func.func @transform_0(%arg0: i32) -> (i32, i32) {
    %c0_i32 = arith.constant 0 : i32
    %c0_i32_0 = arith.constant 0 : i32
    return %c0_i32, %arg0 : i32, i32
  }
  func.func @transform_1(%arg0: i32) -> (i32, i32) {
    %c0_i32 = arith.constant 0 : i32
    %c0_i32_0 = arith.constant 0 : i32
    return %c0_i32, %arg0 : i32, i32
  }
  func.func @transform_2(%arg0: i32) -> (i32, i32) {
    %c0_i32 = arith.constant 0 : i32
    %c0_i32_0 = arith.constant 0 : i32
    return %arg0, %c0_i32 : i32, i32
  }
}

</mosaic_0001>

<bundles_post_ra>
// kernel: tpu_custom_call.1
= control target key start
LH: loop header
LB: loop body
LE: loop exit
PB: predicated region body
PF: predicated region fallthrough
CT: control target
= control target key end

     0   :  { %7 = vsyncpa [#allocation3], 0  ;;  %s237_s0 = inlined_call_operand.hbm [shape: f32[5,8], index: 0, kind: input, shape index: {}]   ;;  %s238_s1 = inlined_call_operand.vmem [shape: s32[1,8], index: 1, kind: input, shape index: {}]   ;;  %s239_s2 = inlined_call_operand.hbm [shape: f32[8,128], index: 2, kind: output, shape index: {}]  }
   0x1   :  { %8 = vsyncpa [#allocation4], 0  ;;  %s188_s9 = smov [#allocation2]   ;;  %s140_s13 = scalar_lea.hbm %s237_s0, 128 }
   0x2   :  { %s15_s10 = sshll.u32 %s188_s9, 4  ;;  %p141_p0 = scmp.ne.s32.totalorder %s237_s0, %s140_s13  ;;  %s16_s10 = int_to_ptr.vmem [resolvable:$true] %s15_s10 }
   0x3   :  { %p144_p1 = scmp.lt.u32.totalorder %s140_s13, %s237_s0 }
   0x5   :  { %p146_p2 = pnand %p144_p1, %p141_p0 }
   0x7   :  { %149 = shalt.err (!%p146_p2)
}
   0x8   :  { %s150_s18 = scalar_lea.vmem %s16_s10, 128  ;;  %p155_p4 = scmp.lt.s32.totalorder %s16_s10, %s16_s10 }
   0x9   :  { %p151_p3 = scmp.ne.s32.totalorder %s16_s10, %s150_s18  ;;  %p156_p5 = scmp.lt.s32.totalorder %s150_s18, %s150_s18 }
   0xb   :  { %p157_p6 = por %p156_p5, %p155_p4 }
   0xd   :  { %p158_p7 = pnand %p157_p6, %p151_p3 }
   0xf   :  { %161 = shalt.err (!%p158_p7)
}
  0x10   :  { %18 = dma.hbm_to_vmem [thread:$0]  %s237_s0, 128, %s16_s10, [#allocation3]  }
  0x11   :  { %184 = dma.done.wait [#allocation3], 128  }
  0x12   :  { %185 = vsyncadd [#allocation3], 4294967168  ;;  %vm32_vm0 = vcmask 61440   ;;  %v24_v0 = vld [vmem:[#allocation2] sm:$0x1f]  ;;  %v26_v4 = vlaneseq  ;;  %v189_v42 = vmov 0.0  }
  0x13   :  { %v33_v1 = vsel %vm32_vm0, %v24_v0, -inf  ;;  %v25_v12 = vld [vmem:[%s238_s1] sm:$0x1]  ;;  %vm84_vm8 = vcmask 57344   ;;  %s190_s1 = smov [#allocation5]  }
  0x14   :  { %v34_v2 = vrot.slane %v33_v1, 4  ;;  %v53_v8 = vshrl.u32 %v26_v4, 7  ;;  %v27_v38 = vand.u32 127, %v26_v4  ;;  %s119_s23 = sshll.u32 %s190_s1, 4  ;;  %s120_s23 = int_to_ptr.vmem [resolvable:$true] %s119_s23 }
  0x15   :  { %s162_s25 = scalar_lea.vmem %s120_s23, 128  ;;  %p167_p9 = scmp.lt.s32.totalorder %s120_s23, %s120_s23 }
  0x16   :  { %v35_v3 = vmax.f32 %v33_v1, %v34_v2  ;;  %v56_v11 = vsub.s32 0, %v53_v8  ;;  %vm31_vm7 = vcmp.lt.s32.totalorder %v27_v38, 8  ;;  %vm107_vm9 = vcmp.eq.s32.totalorder %v27_v38, 1  ;;  %p163_p8 = scmp.ne.s32.totalorder %s120_s23, %s162_s25  ;;  %p168_p10 = scmp.lt.s32.totalorder %s162_s25, %s162_s25 }
  0x17   :  { %vm106_vm10 = vcmp.eq.s32.totalorder %v27_v38, 0 }
  0x18   :  { %v36_v5 = vrot.slane %v35_v3, 2  ;;  %v57_v15 = vrot.slane %v25_v12, %v56_v11  ;;  %p169_p11 = por %p168_p10, %p167_p9 }
  0x1a   :  { %v37_v6 = vmax.f32 %v35_v3, %v36_v5  ;;  %vm58_vm2 = vcmp.eq.s32.totalorder %v53_v8, %v57_v15  ;;  %p170_p12 = pnand %p169_p11, %p163_p8 }
  0x1c   :  { %v38_v7 = vrot.slane %v37_v6, 1 }
  0x1e   :  { %v39_v9 = vmax.f32 %v37_v6, %v38_v7 }
  0x20   :  { %v40_v10 = vsub.f32 %v24_v0, %v39_v9  ;;  %vm68_vm1 = vcmp.eq.f32.partialorder %v24_v0, %v39_v9 }
  0x21   :  { %v69_v13 = vsel %vm68_vm1, %v53_v8, 5 }
  0x22   :  { %v41_v14 = vmul.f32 1.442695, %v40_v10  ;;  %v70_v16 = vsel %vm32_vm0, %v69_v13, 2147483647  ;;  %v59_v18 = vsel %vm58_vm2, %v40_v10, 0.0 }
  0x23   :  { %v71_v17 = vrot.slane %v70_v16, 4  ;;  %v60_v20 = vsel %vm32_vm0, %v59_v18, 0.0 }
  0x24   :  { %136 = vpow2.f32 %v41_v14  ;;  %v61_v24 = vrot.slane %v60_v20, 4 }
  0x25   :  { %vm72_vm3 = vcmp.lt.s32.totalorder %v70_v16, %v71_v17 }
  0x26   :  { %v73_v21 = vsel %vm72_vm3, %v70_v16, %v71_v17  ;;  %v62_v28 = vadd.f32 %v61_v24, %v60_v20 }
  0x27   :  { %v74_v25 = vrot.slane %v73_v21, 2 }
  0x28   :  { %v63_v32 = vrot.slane %v62_v28, 2 }
  0x29   :  { %vm75_vm4 = vcmp.lt.s32.totalorder %v73_v21, %v74_v25 }
  0x2a   :  { %v76_v31 = vsel %vm75_vm4, %v73_v21, %v74_v25  ;;  %v64_v35 = vadd.f32 %v63_v32, %v62_v28 }
  0x2b   :  { %v77_v34 = vrot.slane %v76_v31, 1 }
  0x2c   :  { %v65_v36 = vrot.slane %v64_v35, 1 }
  0x2d   :  { %vm78_vm5 = vcmp.lt.s32.totalorder %v76_v31, %v77_v34 }
  0x2e   :  { %v137_v19 = vpop.eup %136  ;;  %v79_v37 = vsel %vm78_vm5, %v76_v31, %v77_v34  ;;  %v66_v39 = vadd.f32 %v65_v36, %v64_v35 }
  0x2f   :  { %v43_v22 = vsel %vm32_vm0, %v137_v19, 0.0  ;;  %vm80_vm6 = vcmp.eq.s32.totalorder %v79_v37, %v25_v12 }
  0x30   :  { %v44_v23 = vrot.slane %v43_v22, 4  ;;  %v128_v43 = vsel %vm80_vm6, 1.0, %v189_v42 }
  0x31   :  { %v95_v46 = vsel %vm31_vm7, %v128_v43, 0.0 }
  0x32   :  { %v45_v26 = vadd.f32 %v44_v23, %v43_v22  ;;  %v96_v48 = vsel %vm84_vm8, %v95_v46, 0.0 }
  0x34   :  { %v46_v27 = vrot.slane %v45_v26, 2 }
  0x36   :  { %v47_v29 = vadd.f32 %v46_v27, %v45_v26 }
  0x38   :  { %v48_v30 = vrot.slane %v47_v29, 1 }
  0x3a   :  { %v49_v33 = vadd.f32 %v48_v30, %v47_v29 }
  0x3c   :  { %138 = vlog2.f32 %v49_v33 }
  0x46   :  { %v139_v40 = vpop.eup %138 }
  0x47   :  { %v51_v41 = vmul.f32 0.6931472, %v139_v40 }
  0x49   :  { %v67_v44 = vsub.f32 %v51_v41, %v66_v39 }
  0x4b   :  { %v83_v45 = vsel %vm31_vm7, %v67_v44, 0.0 }
  0x4c   :  { %v85_v47 = vsel %vm84_vm8, %v83_v45, 0.0 }
  0x4d   :  { %86 = vadd.xlane.f32.xlu0 %v85_v47 }
  0x51   :  { %97 = vadd.xlane.f32.xlu0 %v96_v48 }
  0xda   :  { %v87_v49 = vpop.xlane.xlu0 %86 }
  0xdb   :  { %v88_v50 = vrot.slane %v87_v49, 4 }
  0xdd   :  { %v89_v51 = vadd.f32 %v88_v50, %v87_v49 }
  0xde   :  { %v98_v52 = vpop.xlane.xlu0 %97 }
  0xdf   :  { %v90_v53 = vrot.slane %v89_v51, 2  ;;  %v99_v54 = vrot.slane %v98_v52, 4 }
  0xe1   :  { %v100_v55 = vadd.f32 %v99_v54, %v98_v52  ;;  %v91_v56 = vadd.f32 %v90_v53, %v89_v51 }
  0xe3   :  { %v101_v57 = vrot.slane %v100_v55, 2  ;;  %v92_v58 = vrot.slane %v91_v56, 1 }
  0xe5   :  { %v102_v59 = vadd.f32 %v101_v57, %v100_v55  ;;  %v93_v60 = vadd.f32 %v92_v58, %v91_v56 }
  0xe7   :  { %129 = vpush %v93_v60  ;;  %v103_v61 = vrot.slane %v102_v59, 1 }
  0xe9   :  { %v104_v62 = vadd.f32 %v103_v61, %v102_v59 }
  0xeb   :  { %131 = vpush %v104_v62 }
 0x118   :  { %s130_s0 = spop %129 }
 0x119   :  { %v110_v0 = vstv %s130_s0 }
 0x11c   :  { %s132_s24 = spop %131 }
 0x11d   :  { %v108_v63 = vstv %s132_s24 }
 0x11e   :  { %v109_v1 = vsel %vm107_vm9, %v108_v63, 0.0 }
 0x11f   :  { %v111_v2 = vsel %vm106_vm10, %v110_v0, %v109_v1 }
 0x120   :  { %112 = vst [vmem:[#allocation5] sm:$0xff] %v111_v2 }
 0x121   :  { %173 = shalt.err (!%p170_p12)
}
 0x122   :  { %s174_s28 = scalar_lea.hbm %s239_s2, 128 }
 0x123   :  { %p175_p13 = scmp.ne.s32.totalorder %s239_s2, %s174_s28  ;;  %p178_p0 = scmp.lt.u32.totalorder %s174_s28, %s239_s2 }
 0x125   :  { %p180_p1 = pnand %p178_p0, %p175_p13 }
 0x127   :  { %183 = shalt.err (!%p180_p1)
}
 0x128   :  { %122 = dma.vmem_to_hbm [thread:$0]  %s120_s23, 128, %s239_s2, [#allocation4]  }
 0x129   :  { %186 = dma.done.wait [#allocation4], 128  }
 0x12a   :  { %187 = vsyncadd [#allocation4], 4294967168 }
 0x12b   :  { %126 = vsyncpa [#allocation3], 1 }
 0x12c   :  { %127 = vsyncpa [#allocation4], 1 }

</bundles_post_ra>
